<compile_context>
chip_gen: v7x
topology: tpu7x:2x2x1
jax: 0.10.0
libtpu: 0.0.40
codegen_flags: <defaults>
</compile_context>

<pallas_src>
import functools

import jax
import jax.numpy as jnp
from jax.experimental import pallas as pl
from jax.experimental.pallas import tpu as pltpu


def _round_up(x, m):
    return ((x + m - 1) // m) * m


def _ce_partial_kernel(logits_ref, targets_ref, out_ref, *, n_valid, tile_n):
    """Partial cross-entropy sum over one lane tile of rows.

    logits_ref : (C, tile_n)  model dtype -- classes on sublanes, rows on lanes
    targets_ref: (1, tile_n)  int32       -- lane-dense target classes
    out_ref    : (1, 8, 128)  f32         -- partial sum broadcast into a block
    """
    i = pl.program_id(0)

    x = logits_ref[...].astype(jnp.float32)               # (C, tile_n)
    t = targets_ref[...]                                   # (1, tile_n)

    # Numerically stable log-sum-exp over the class (sublane) axis.
    m = jnp.max(x, axis=0, keepdims=True)                  # (1, tile_n)
    lse = m + jnp.log(jnp.sum(jnp.exp(x - m), axis=0, keepdims=True))

    # Gather the target-class logit via sublane-iota compare (no dynamic gather
    # on TPU).  Garbage in padded lanes stays confined to its own column.
    cls = jax.lax.broadcasted_iota(jnp.int32, x.shape, 0)
    picked = jnp.sum(jnp.where(cls == t, x, 0.0), axis=0, keepdims=True)

    losses = lse - picked                                   # per-row CE, (1, tile_n)

    # Mask lanes beyond the true N (last-tile padding holds undefined VMEM);
    # jnp.where selects 0 there, so NaN/Inf garbage is discarded before the sum.
    col = jax.lax.broadcasted_iota(jnp.int32, (1, tile_n), 1)
    valid = (i * tile_n + col) < n_valid
    partial = jnp.sum(jnp.where(valid, losses, 0.0))

    out_ref[...] = jnp.full((1, 8, 128), partial, dtype=jnp.float32)


def custom_categorical_cross_entropy_loss(inputs, targets, *,
                                          target_tile_bytes=4 << 20,
                                          max_tile_cols=1 << 16):
    """inputs: (B, 6, C) or (B, C, 6) float, targets: (B, 6) int -> scalar f32."""
    B, d1, d2 = inputs.shape
    N = B * 6
    # Match torch's branch order exactly: num_columns == 6 is checked first,
    # so an ambiguous (B, 6, 6) input takes the inputs[:, :, i] path.
    if d2 == 6:
        C = d1
        # predictions for digit i are inputs[:, :, i]; column n = b*6 + i of the
        # (C, N) matrix.  One pass over the (small, captcha-sized) logits; the
        # digit axis cannot be folded onto lanes by an index_map alone.
        # TODO(synk): for large C a row-major (N, C) kernel path would avoid
        # this wrapper-side transpose entirely.
        logits_t = jnp.swapaxes(inputs, 0, 1).reshape(C, N)
    elif d1 == 6:
        C = d2
        logits_t = jnp.transpose(inputs.reshape(N, C))       # (C, N)
    else:
        raise ValueError(f"Invalid input shape: {inputs.shape}")

    tgt = targets.reshape(1, N).astype(jnp.int32)

    itembytes = jnp.dtype(logits_t.dtype).itemsize
    # Sublane packing of the logits dtype (f32: 8, bf16: 16, int8/fp8: 32).
    sublane_pack = max(8, 32 // max(1, itembytes))
    c_pad = _round_up(C, sublane_pack)
    n_pad = _round_up(N, 128)

    # Lane width per tile, sized from the padded VMEM footprint so each logits
    # buffer carries ~target_tile_bytes, rounded down to a multiple of 128.
    tile_n = (target_tile_bytes // max(1, c_pad * itembytes)) // 128 * 128
    tile_n = int(max(128, min(tile_n, n_pad, max_tile_cols)))
    # v7x: keep at least two grid steps so both TensorCores get work.
    if tile_n >= n_pad and n_pad >= 256:
        tile_n = _round_up(pl.cdiv(N, 2), 128)
    num_tiles = pl.cdiv(N, tile_n)

    # Padded, double-buffered VMEM footprint: logits tile + lane-dense targets
    # (8-sublane padded int32) + partials block, plus headroom.  Cap at 32 MiB
    # so v7x (64 MiB physical / 32 MiB scoped default) keeps headroom.
    logits_blk = c_pad * tile_n * itembytes
    tgt_blk = 8 * tile_n * 4
    out_blk = 8 * 128 * 4
    needed = 2 * (logits_blk + tgt_blk + out_blk)
    vmem_limit = int(min(32 << 20, max(needed + (2 << 20), 4 << 20)))

    kernel = functools.partial(_ce_partial_kernel, n_valid=N, tile_n=tile_n)

    grid_spec = pltpu.PrefetchScalarGridSpec(
        num_scalar_prefetch=0,
        grid=(num_tiles,),
        in_specs=[
            pl.BlockSpec((C, tile_n), lambda i: (0, i)),   # logits lane tile
            pl.BlockSpec((1, tile_n), lambda i: (0, i)),   # matching targets
        ],
        out_specs=pl.BlockSpec((1, 8, 128), lambda i: (i, 0, 0)),
    )

    cost = pl.CostEstimate(
        flops=int(6 * N * C),
        transcendentals=int(N * C + N),
        bytes_accessed=int(C * n_pad * itembytes + n_pad * 4
                           + num_tiles * 8 * 128 * 4),
    )

    partials = pl.pallas_call(
        kernel,
        out_shape=jax.ShapeDtypeStruct((num_tiles, 8, 128), jnp.float32),
        grid_spec=grid_spec,
        compiler_params=pltpu.CompilerParams(
            dimension_semantics=("parallel",),
            vmem_limit_bytes=vmem_limit,
        ),
        cost_estimate=cost,
    )(logits_t, tgt)

    # Tiny finishing reduction over per-tile partial sums (kept outside the
    # kernel so the grid axis stays "parallel" across TensorCores on v7x).
    return jnp.sum(partials[:, 0, 0]) / jnp.float32(N)


def _reference_loss(inputs, targets):
    # Pure-JAX reference mirroring the torch loop exactly (num_cols checked first).
    _, num_rows, num_cols = inputs.shape
    losses = []
    for i in range(6):
        if num_cols == 6:
            preds = inputs[:, :, i].astype(jnp.float32)
        elif num_rows == 6:
            preds = inputs[:, i, :].astype(jnp.float32)
        else:
            raise ValueError(f"Invalid input shape: {inputs.shape}")
        t = targets[:, i]
        lse = jax.nn.logsumexp(preds, axis=-1)
        picked = jnp.take_along_axis(preds, t[:, None], axis=-1)[:, 0]
        losses.append(jnp.mean(lse - picked))
    return jnp.mean(jnp.stack(losses))


if __name__ == "__main__":
    key = jax.random.PRNGKey(0)
    k1, k2, k3, k4, k5, k6 = jax.random.split(key, 6)

    # Case 1: (B, 6, C) layout, large enough that the lane axis splits into two
    # 256-wide tiles (N = 384) and the last tile's padding is masked.
    B1, C1 = 64, 10
    inputs1 = jax.random.normal(k1, (B1, 6, C1), dtype=jnp.float32)
    targets1 = jax.random.randint(k2, (B1, 6), 0, C1, dtype=jnp.int32)
    loss1 = jax.block_until_ready(
        custom_categorical_cross_entropy_loss(inputs1, targets1))
    ref1 = _reference_loss(inputs1, targets1)
    assert jnp.allclose(loss1, ref1, rtol=1e-5, atol=1e-5), (loss1, ref1)

    # Case 2: (B, C, 6) layout, tiny batch -> single mostly-padded lane tile.
    B2, C2 = 3, 13
    inputs2 = jax.random.normal(k3, (B2, C2, 6), dtype=jnp.float32)
    targets2 = jax.random.randint(k4, (B2, 6), 0, C2, dtype=jnp.int32)
    loss2 = jax.block_until_ready(
        custom_categorical_cross_entropy_loss(inputs2, targets2))
    ref2 = _reference_loss(inputs2, targets2)
    assert jnp.allclose(loss2, ref2, rtol=1e-5, atol=1e-5), (loss2, ref2)

    # Case 3: ambiguous (B, 6, 6) shape -- must follow torch's num_cols-first rule.
    B3 = 4
    inputs3 = jax.random.normal(k5, (B3, 6, 6), dtype=jnp.float32)
    targets3 = jax.random.randint(k6, (B3, 6), 0, 6, dtype=jnp.int32)
    loss3 = jax.block_until_ready(
        custom_categorical_cross_entropy_loss(inputs3, targets3))
    ref3 = _reference_loss(inputs3, targets3)
    assert jnp.allclose(loss3, ref3, rtol=1e-5, atol=1e-5), (loss3, ref3)

    print("KERNEL_OK")
</pallas_src>

<mosaic_0001>
module attributes {stable_mosaic.version = 11 : i64} {
  func.func @_ce_partial_kernel(%arg0: i32, %arg1: memref<10x256xf32, #tpu.memory_space<vmem>>, %arg2: memref<1x256xi32, #tpu.memory_space<vmem>>, %arg3: memref<1x8x128xf32, #tpu.memory_space<vmem>>) attributes {dimension_semantics = [#tpu.dimension_semantics<parallel>], iteration_bounds = array<i64: 2>, scalar_prefetch = 0 : i64, scratch_operands = 0 : i64, tpu.core_type = #tpu.core_type<tc>, window_params = [{transform_indices = @transform_0, window_bounds = array<i64: 10, 256>}, {transform_indices = @transform_1, window_bounds = array<i64: 1, 256>}, {transform_indices = @transform_2, window_bounds = array<i64: 1, 8, 128>}]} {
    %c0 = arith.constant 0 : index
    %c0_0 = arith.constant 0 : index
    %0 = vector.load %arg1[%c0, %c0_0] : memref<10x256xf32, #tpu.memory_space<vmem>>, vector<10x256xf32>
    %c0_1 = arith.constant 0 : index
    %c0_2 = arith.constant 0 : index
    %1 = vector.load %arg2[%c0_1, %c0_2] : memref<1x256xi32, #tpu.memory_space<vmem>>, vector<1x256xi32>
    %cst = arith.constant dense<0xFF800000> : vector<256xf32>
    %2 = vector.multi_reduction <maximumf>, %0, %cst [0] : vector<10x256xf32> to vector<256xf32>
    %3 = vector.shape_cast %2 : vector<256xf32> to vector<1x256xf32>
    %4 = vector.broadcast %3 : vector<1x256xf32> to vector<10x256xf32>
    %5 = arith.subf %0, %4 : vector<10x256xf32>
    %6 = math.exp %5 : vector<10x256xf32>
    %cst_3 = arith.constant dense<0.000000e+00> : vector<256xf32>
    %7 = vector.multi_reduction <add>, %6, %cst_3 [0] : vector<10x256xf32> to vector<256xf32>
    %8 = vector.shape_cast %7 : vector<256xf32> to vector<1x256xf32>
    %9 = math.log %8 : vector<1x256xf32>
    %10 = arith.addf %3, %9 : vector<1x256xf32>
    %11 = tpu.iota {dimensions = array<i32: 0>} : vector<10x256xi32>
    %12 = vector.broadcast %1 : vector<1x256xi32> to vector<10x256xi32>
    %13 = arith.cmpi eq, %11, %12 : vector<10x256xi32>
    %cst_4 = arith.constant 0.000000e+00 : f32
    %14 = vector.broadcast %cst_4 : f32 to vector<10x256xf32>
    %15 = arith.select %13, %0, %14 : vector<10x256xi1>, vector<10x256xf32>
    %cst_5 = arith.constant dense<0.000000e+00> : vector<256xf32>
    %16 = vector.multi_reduction <add>, %15, %cst_5 [0] : vector<10x256xf32> to vector<256xf32>
    %17 = vector.shape_cast %16 : vector<256xf32> to vector<1x256xf32>
    %18 = arith.subf %10, %17 : vector<1x256xf32>
    %19 = tpu.iota {dimensions = array<i32: 1>} : vector<1x256xi32>
    %c256_i32 = arith.constant 256 : i32
    %20 = arith.muli %arg0, %c256_i32 : i32
    %21 = vector.broadcast %20 : i32 to vector<1x256xi32>
    %22 = arith.addi %21, %19 : vector<1x256xi32>
    %c384_i32 = arith.constant 384 : i32
    %23 = vector.broadcast %c384_i32 : i32 to vector<1x256xi32>
    %24 = arith.cmpi slt, %22, %23 : vector<1x256xi32>
    %cst_6 = arith.constant 0.000000e+00 : f32
    %25 = vector.broadcast %cst_6 : f32 to vector<1x256xf32>
    %26 = arith.select %24, %18, %25 : vector<1x256xi1>, vector<1x256xf32>
    %27 = vector.shape_cast %26 : vector<1x256xf32> to vector<1x1x256xf32>
    %cst_7 = arith.constant dense<0.000000e+00> : vector<1xf32>
    %28 = vector.multi_reduction <add>, %27, %cst_7 [1, 2] : vector<1x1x256xf32> to vector<1xf32>
    %29 = vector.shape_cast %28 : vector<1xf32> to vector<1x1x1xf32>
    %30 = vector.extract %29[0, 0, 0] : f32 from vector<1x1x1xf32>
    %31 = vector.broadcast %30 : f32 to vector<1x8x128xf32>
    %c0_8 = arith.constant 0 : index
    %c0_9 = arith.constant 0 : index
    %c0_10 = arith.constant 0 : index
    %32 = vector.load %arg3[%c0_8, %c0_9, %c0_10] : memref<1x8x128xf32, #tpu.memory_space<vmem>>, vector<1x8x128xf32>
    tpu.vector_store %arg3[%c0_8, %c0_9, %c0_10], %31 {strides = array<i32>} : memref<1x8x128xf32, #tpu.memory_space<vmem>>, vector<1x8x128xf32>,
    return
  }
  func.func @transform_0(%arg0: i32) -> (i32, i32) {
    %c0_i32 = arith.constant 0 : i32
    %c0_i32_0 = arith.constant 0 : i32
    return %c0_i32, %arg0 : i32, i32
  }
  func.func @transform_1(%arg0: i32) -> (i32, i32) {
    %c0_i32 = arith.constant 0 : i32
    %c0_i32_0 = arith.constant 0 : i32
    return %c0_i32, %arg0 : i32, i32
  }
  func.func @transform_2(%arg0: i32) -> (i32, i32, i32) {
    %c0_i32 = arith.constant 0 : i32
    %c0_i32_0 = arith.constant 0 : i32
    %c0_i32_1 = arith.constant 0 : i32
    return %arg0, %c0_i32, %c0_i32_0 : i32, i32, i32
  }
}

</mosaic_0001>

<bundles_post_ra>
// kernel: tpu_custom_call.1
= control target key start
LH: loop header
LB: loop body
LE: loop exit
PB: predicated region body
PF: predicated region fallthrough
CT: control target
= control target key end

     0   :  { %7 = vsyncpa [#allocation3], 0  ;;  %s805_s0 = inlined_call_operand.hbm [shape: f32[10,384], index: 0, kind: input, shape index: {}]   ;;  %s806_s1 = inlined_call_operand.vmem [shape: s32[1,384], index: 1, kind: input, shape index: {}]   ;;  %s807_s2 = inlined_call_operand.hbm [shape: f32[2,8,128], index: 2, kind: output, shape index: {}]  }
   0x1   :  { %9 = vsyncpa [#allocation3 + $0x1], 0 }
   0x2   :  { %10 = vsyncpa [#allocation4], 0 }
   0x3   :  { %12 = vsyncpa [#allocation4 + $0x1], 0  ;;  %s619_s9 = smov 0   ;;  %s621_s10 = smov 0  }
   0x4   :  { %s623_s11 = smov 0   ;;  %s625_s12 = smov 0  }
   0x5 LB: > { %s640_s13 = sadd.s32 4294967295, %s598_s12   ;;  %s425_s14 = sadd.s32 4294967294, %s598_s12   ;;  %s598_s12 = sphi %s625_s12, %s817_s12   ;;  %s594_s11 = sphi %s623_s11, %s816_s11   ;;  %s590_s10 = sphi %s621_s10, %s815_s10   ;;  %s586_s9 = sphi %s619_s9, %s814_s9  }
   0x6   : > { %s644_s15 = sadd.s32 1, %s598_s12   ;;  %s25_s16 = sadd.s32 1, %s594_s11 }
   0x7   : > { %s22_s17 = ssub.s32 %s598_s12, %s644_s15  ;;  %p32_p0 = scmp.ne.s32.totalorder %s594_s11, %s590_s10 }
   0x8   : > { %p23_p1 = scmp.eq.s32.totalorder %s22_s17, 0  ;;  %p33_p2 = scmp.eq.s32.totalorder %s598_s12, 0 }
   0x9   : > { %p38_p3 = scmp.ne.s32.totalorder %s590_s10, %s586_s9  ;;  %p39_p4 = scmp.eq.s32.totalorder %s640_s13, 0 }
   0xa   : > { %s656_s18 = scalar_select %p23_p1, %s594_s11, %s25_s16  }
   0xb   : > { %p34_p5 = por %p33_p2, %p32_p0  ;;  %p658_p6 = por %p39_p4, %p38_p3 }
   0xc   : > { %p88_p7 = scmp.eq.s32.totalorder %s640_s13, 1  ;;  %p94_p8 = scmp.eq.s32.totalorder %s425_s14, 1 }
   0xd   : > { %p808_p11 = scmp.ge.s32.totalorder %s598_s12, 2 }
   0xe   : > { %p663_p9 = por %p88_p7, %p32_p0  ;;  %p667_p10 = por %p94_p8, %p38_p3 }
   0xf   : > { %110 = sbr.rel (%p808_p11) target bundleno = 57 (0x39), region = 16 }
  0x10   : > { %s811_s21 = scalar_select %p667_p10, 1, 0 }
  0x16   : > { %113 = sbr.rel (!%p34_p5) target bundleno = 57 (0x39), region = 20  ;;  %s114_s22 = sand.u32 (%p34_p5), 1, %s594_s11  }
  0x17   : > { %s429_s23 = sshll.u32 (%p34_p5), %s598_s12, 1  ;;  %s428_s24 = sshll.u32 (%p34_p5), %s114_s22, 5 }
  0x18   : > { %s120_s25 = ssub.s32 (%p34_p5), 3, %s429_s23  ;;  %s682_s28 = scalar_lea.sflag (%p34_p5), [#allocation3], %s114_s22 }
  0x19   : > { %p121_p12 = scmp.lt.s32.totalorder (%p34_p5), %s120_s25, 2  ;;  %s118_s29 = scalar_lea.vmem (%p34_p5), [#allocation2], %s428_s24 }
  0x1d   : > { %s819_s25 = smov (!%p121_p12, %s120_s25), 2 }
  0x1e   : > { %s679_s26 = sshll.u32 %s819_s25, 8 }
  0x1f   : > { %s125_s27 = ssub.s32 512, %s679_s26 }
  0x20   : > { %126 = vsyncadd %s682_s28, %s125_s27  ;;  %p431_p13 = scmp.ne.s32.totalorder %s679_s26, 0  ;;  %s445_s30 = sshll.u32 %s598_s12, 8 }
  0x21   : > { %s690_s5 = scalar_lea.hbm %s805_s0, %s445_s30  ;;  %s433_s6 = sshll.u32 %s819_s25, 3 }
  0x22   : > { %s132_s7 = sshll.u32 %s118_s29, 4  ;;  %s504_s8 = scalar_lea.hbm %s690_s5, %s679_s26  ;;  %s693_s7 = int_to_ptr.vmem [resolvable:$true] %s132_s7 }
  0x23   : > { %p505_p0 = scmp.ne.s32.totalorder %s690_s5, %s504_s8  ;;  %s508_s17 = scalar_lea.hbm %s805_s0, 768 }
  0x24   : > { %p509_p3 = scmp.lt.u32.totalorder %s690_s5, %s805_s0  ;;  %p510_p4 = scmp.lt.u32.totalorder %s508_s17, %s504_s8 }
  0x25   : > { %p506_p1 = pnand %p505_p0, %p431_p13  ;;  %p512_p7 = scmp.lt.u32.totalorder %s504_s8, %s690_s5 }
  0x26   : > { %p511_p5 = por %p510_p4, %p509_p3 }
  0x27   : > { %p507_p2 = pneg %p506_p1 }
  0x28   : > { %p513_p8 = por %p512_p7, %p511_p5 }
  0x2a   : > { %p514_p12 = pnand %p513_p8, %p507_p2 }
  0x2c   : > { %517 = shalt.err (!%p514_p12)
}
  0x2d   : > { %s518_s24 = scalar_lea.vmem %s693_s7, %s679_s26  ;;  %s600_s27 = smov [#allocation2]  }
  0x2e   : > { %p519_p0 = scmp.ne.s32.totalorder %s693_s7, %s518_s24  ;;  %s522_s29 = sshll.u32 %s600_s27, 4  ;;  %s523_s29 = int_to_ptr.vmem [resolvable:$false] %s522_s29 }
  0x2f   : > { %s524_s30 = scalar_lea.vmem %s523_s29, 1024  ;;  %p525_p10 = scmp.lt.s32.totalorder %s693_s7, %s523_s29 }
  0x30   : > { %p520_p1 = pnand %p519_p0, %p431_p13  ;;  %p526_p3 = scmp.lt.s32.totalorder %s524_s30, %s518_s24 }
  0x32   : > { %p521_p11 = pneg %p520_p1  ;;  %p527_p4 = por %p526_p3, %p525_p10 }
  0x34   : > { %p528_p5 = pnand %p527_p4, %p521_p11 }
  0x36   : > { %531 = shalt.err (!%p528_p5)
}
  0x37   : > { %s601_s3 = smov 384   ;;  %s602_s4 = smov 256  }
  0x38   : > { %138 = dma.hbm_to_vmem [thread:$0]  (%p431_p13), %s690_s5, %s679_s26, %s693_s7, %s682_s28, %s601_s3, %s602_s4, %s433_s6  }
  0x39 PF: > { %p436_p2 = scmp.ge.s32.totalorder %s598_s12, 1  ;;  %p156_p7 = scmp.lt.s32.totalorder %s598_s12, 3 }
  0x3b   : > { %p157_p10 = pnand %p436_p2, %p156_p7 }
  0x3c   : > { %s725_s8 = sand.u32 (!%p157_p10), 1, %s590_s10  }
  0x3d   : > { %160 = sbr.rel (%p157_p10) target bundleno = 359 (0x167), region = 28  ;;  %s437_s14 = sshll.u32 (!%p157_p10), %s725_s8, 5 }
  0x3e   : > { %s163_s16 = scalar_lea.sflag (!%p157_p10), [#allocation3], %s725_s8  ;;  %s166_s17 = scalar_lea.vmem (!%p157_p10), [#allocation2], %s437_s14 }
  0x44   : > { %577 = dma.done.wait (%p658_p6), %s163_s16, 512  }
  0x45   : > { %579 = vsyncadd (%p658_p6), %s163_s16, 4294966784  ;;  %vm218_vm0 = vcmask 1041408   ;;  %v213_v0 = vld [vmem:[%s166_s17] sm:$0xff]  ;;  %v214_v1 = vld [vmem:[%s166_s17 + $0x8] sm:$0xff]  ;;  %s439_s25 = sshll.u32 %s640_s13, 1  ;;  %v269_v15 = vlaneseq  ;;  %s440_s5 = sshll.u32 %s640_s13, 8 }
  0x46   : > { %v215_v2 = vld [vmem:[%s166_s17 + $0x10] sm:$0x3]  ;;  %v216_v3 = vld [vmem:[%s166_s17 + $0x18] sm:$0x3]  ;;  %p205_p11 = scmp.lt.s32.totalorder %s439_s25, 2  ;;  %vm317_vm7 = vcmask 1040384  }
  0x47   : > { %v219_v4 = vsel %vm218_vm0, %v215_v2, -inf  ;;  %v227_v6 = vsel %vm218_vm0, %v216_v3, -inf  ;;  %v270_v20 = vshrl.u32 %v269_v15, 7  ;;  %s438_s6 = sshll.u32 %s725_s8, 3  ;;  %s442_s23 = sshll.u32 %s640_s13, 7 }
  0x48   : > { %v220_v5 = vmax.f32 %v213_v0, %v219_v4  ;;  %v228_v7 = vmax.f32 %v214_v1, %v227_v6  ;;  %s821_s25 = smov (!%p205_p11, %s439_s25), 2  ;;  %s194_s7 = scalar_lea.vmem [#allocation5], %s438_s6 }
  0x49   : > { %s207_s28 = scalar_lea.vmem %s806_s1, %s821_s25  ;;  %v274_v28 = vsub.s32 0, %v270_v20  ;;  %v278_v29 = vsub.s32 1, %v270_v20  ;;  %v271_v33 = vadd.s32 8, %v270_v20  ;;  %s346_s22 = sshll.u32 %s194_s7, 4  ;;  %s758_s22 = int_to_ptr.vmem [resolvable:$true] %s346_s22 }
  0x4a   : > { %v221_v8 = vrot.slane %v220_v5, 4  ;;  %v229_v9 = vrot.slane %v228_v7, 4  ;;  %v217_v30 = vld [vmem:[%s207_s28] sm:$0x3]  ;;  %s763_s30 = scalar_lea.hbm %s807_s2, %s442_s23  ;;  %s333_s3 = scalar_lea.sflag [#allocation4], %s725_s8 }
  0x4b   : > { %v275_v34 = vrot.slane %v217_v30, %v274_v28  ;;  %v279_v35 = vrot.slane %v217_v30, %v278_v29  ;;  %s532_s4 = scalar_lea.vmem %s758_s22, 128  ;;  %s603_s13 = smov [#allocation5]  }
  0x4c   : > { %v222_v10 = vmax.f32 %v220_v5, %v221_v8  ;;  %v230_v11 = vmax.f32 %v228_v7, %v229_v9  ;;  %v307_v7 = vand.u32 127, %v269_v15  ;;  %p533_p6 = scmp.ne.s32.totalorder %s758_s22, %s532_s4  ;;  %s536_s14 = sshll.u32 %s603_s13, 4  ;;  %s537_s14 = int_to_ptr.vmem [resolvable:$false] %s536_s14 }
  0x4d   : > { %vm282_vm1 = vcmp.eq.s32.totalorder %v271_v33, %v275_v34  ;;  %vm283_vm2 = vcmp.eq.s32.totalorder %v271_v33, %v279_v35  ;;  %vm280_vm3 = vcmp.eq.s32.totalorder %v270_v20, %v275_v34  ;;  %vm281_vm4 = vcmp.eq.s32.totalorder %v270_v20, %v279_v35  ;;  %s538_s16 = scalar_lea.vmem %s537_s14, 256  ;;  %p539_p12 = scmp.lt.s32.totalorder %s758_s22, %s537_s14 }
  0x4e   : > { %v223_v12 = vrot.slane %v222_v10, 2  ;;  %v231_v13 = vrot.slane %v230_v11, 2  ;;  %v286_v36 = vsel %vm282_vm1, %v215_v2, 0.0  ;;  %v287_v38 = vsel %vm283_vm2, %v216_v3, 0.0  ;;  %p534_p13 = pnand %p533_p6, %p663_p9  ;;  %p540_p0 = scmp.lt.s32.totalorder %s538_s16, %s532_s4 }
  0x4f   : > { %v284_v41 = vsel %vm280_vm3, %v213_v0, 0.0  ;;  %v288_v42 = vsel %vm218_vm0, %v286_v36, 0.0  ;;  %v285_v45 = vsel %vm281_vm4, %v214_v1, 0.0  ;;  %v296_v46 = vsel %vm218_vm0, %v287_v38, 0.0 }
  0x50   : > { %v224_v14 = vmax.f32 %v222_v10, %v223_v12  ;;  %v232_v16 = vmax.f32 %v230_v11, %v231_v13  ;;  %v289_v50 = vadd.f32 %v288_v42, %v284_v41  ;;  %v297_v52 = vadd.f32 %v296_v46, %v285_v45  ;;  %p535_p8 = pneg %p534_p13  ;;  %p541_p1 = por %p540_p0, %p539_p12 }
  0x51   : > { %v308_v10 = vadd.s32 128, %v307_v7  ;;  %v310_v11 = vstv %s440_s5 }
  0x52   : > { %v225_v17 = vrot.slane %v224_v14, 1  ;;  %v233_v18 = vrot.slane %v232_v16, 1  ;;  %v290_v56 = vrot.slane %v289_v50, 4  ;;  %v298_v58 = vrot.slane %v297_v52, 4  ;;  %p542_p3 = pnand %p541_p1, %p535_p8 }
  0x53   : > { %v312_v20 = vadd.s32 %v310_v11, %v308_v10 }
  0x54   : > { %v736_v19 = vmax.f32 %v224_v14, %v225_v17  ;;  %v739_v21 = vmax.f32 %v232_v16, %v233_v18  ;;  %v291_v62 = vadd.f32 %v290_v56, %v289_v50  ;;  %v311_v14 = vadd.s32 %v310_v11, %v307_v7 }
  0x55   : > { %vm314_vm6 = vcmp.lt.s32.totalorder %v312_v20, 384 }
  0x56   : > { %v235_v22 = vsub.f32 %v213_v0, %v736_v19  ;;  %v237_v23 = vsub.f32 %v215_v2, %v736_v19  ;;  %v236_v24 = vsub.f32 %v214_v1, %v739_v21  ;;  %v238_v25 = vsub.f32 %v216_v3, %v739_v21 }
  0x57   : > { %v299_v0 = vadd.f32 %v298_v58, %v297_v52  ;;  %v292_v4 = vrot.slane %v291_v62, 2  ;;  %vm313_vm5 = vcmp.lt.s32.totalorder %v311_v14, 384 }
  0x58   : > { %v239_v26 = vmul.f32 1.442695, %v235_v22  ;;  %v243_v27 = vmul.f32 1.442695, %v237_v23  ;;  %v241_v31 = vmul.f32 1.442695, %v236_v24 }
  0x59   : > { %v245_v32 = vmul.f32 1.442695, %v238_v25  ;;  %v300_v5 = vrot.slane %v299_v0, 2  ;;  %v293_v6 = vadd.f32 %v292_v4, %v291_v62 }
  0x5a   : > { %492 = vpow2.f32 %v239_v26 }
  0x5b   : > { %494 = vpow2.f32 %v241_v31  ;;  %v301_v8 = vadd.f32 %v300_v5, %v299_v0  ;;  %v294_v9 = vrot.slane %v293_v6, 1 }
  0x5c   : > { %496 = vpow2.f32 %v243_v27 }
  0x5d   : > { %498 = vpow2.f32 %v245_v32  ;;  %v302_v12 = vrot.slane %v301_v8, 1  ;;  %v295_v18 = vadd.f32 %v294_v9, %v293_v6 }
  0x5f   : > { %v303_v23 = vadd.f32 %v302_v12, %v301_v8 }
  0x64   : > { %v493_v37 = vpop.eup %492 }
  0x65   : > { %v495_v39 = vpop.eup %494 }
  0x66   : > { %v497_v40 = vpop.eup %496 }
  0x67   : > { %v499_v43 = vpop.eup %498  ;;  %v247_v44 = vsel %vm218_vm0, %v497_v40, 0.0 }
  0x68   : > { %v248_v47 = vadd.f32 %v493_v37, %v247_v44  ;;  %v255_v48 = vsel %vm218_vm0, %v499_v43, 0.0 }
  0x69   : > { %v256_v49 = vadd.f32 %v495_v39, %v255_v48 }
  0x6a   : > { %v249_v51 = vrot.slane %v248_v47, 4 }
  0x6b   : > { %v257_v53 = vrot.slane %v256_v49, 4 }
  0x6c   : > { %v250_v54 = vadd.f32 %v249_v51, %v248_v47 }
  0x6d   : > { %v258_v55 = vadd.f32 %v257_v53, %v256_v49 }
  0x6e   : > { %v251_v57 = vrot.slane %v250_v54, 2 }
  0x6f   : > { %v259_v59 = vrot.slane %v258_v55, 2 }
  0x70   : > { %v252_v60 = vadd.f32 %v251_v57, %v250_v54 }
  0x71   : > { %v260_v61 = vadd.f32 %v259_v59, %v258_v55 }
  0x72   : > { %v253_v63 = vrot.slane %v252_v60, 1 }
  0x73   : > { %v261_v1 = vrot.slane %v260_v61, 1 }
  0x74   : > { %v254_v2 = vadd.f32 %v253_v63, %v252_v60 }
  0x75   : > { %v262_v3 = vadd.f32 %v261_v1, %v260_v61 }
  0x76   : > { %500 = vlog2.f32 %v254_v2 }
  0x77   : > { %502 = vlog2.f32 %v262_v3 }
  0x80   : > { %v501_v13 = vpop.eup %500 }
  0x81   : > { %v503_v16 = vpop.eup %502  ;;  %v264_v17 = vmul.f32 0.6931472, %v501_v13 }
  0x82   : > { %v266_v22 = vmul.f32 0.6931472, %v503_v16 }
  0x83   : > { %v267_v24 = vadd.f32 %v264_v17, %v736_v19 }
  0x84   : > { %v268_v25 = vadd.f32 %v266_v22, %v739_v21 }
  0x85   : > { %v304_v15 = vsub.f32 %v267_v24, %v295_v18 }
  0x86   : > { %v305_v26 = vsub.f32 %v268_v25, %v303_v23 }
  0x87   : > { %v315_v27 = vsel %vm313_vm5, %v304_v15, 0.0 }
  0x88   : > { %v316_v28 = vsel %vm314_vm6, %v305_v26, 0.0  ;;  %v318_v29 = vsel %vm317_vm7, %v315_v27, 0.0 }
  0x89   : > { %v319_v30 = vsel %vm317_vm7, %v316_v28, 0.0 }
  0x8a   : > { %v320_v31 = vadd.f32 %v319_v30, %v318_v29 }
  0x8c   : > { %321 = vadd.xlane.f32.xlu0 %v320_v31 }
 0x119   : > { %v322_v32 = vpop.xlane.xlu0 %321 }
 0x11a   : > { %v323_v33 = vrot.slane %v322_v32, 4 }
 0x11c   : > { %v324_v34 = vadd.f32 %v323_v33, %v322_v32 }
 0x11e   : > { %v325_v19 = vrot.slane %v324_v34, 2 }
 0x120   : > { %v326_v35 = vadd.f32 %v325_v19, %v324_v34 }
 0x122   : > { %v327_v21 = vrot.slane %v326_v35, 1 }
 0x124   : > { %v328_v36 = vadd.f32 %v327_v21, %v326_v35 }
 0x126   : > { %448 = vpush %v328_v36 }
 0x157   : > { %s449_s24 = spop %448 }
 0x158   : > { %v330_v37 = vstv %s449_s24 }
 0x159   : > { %331 = vst [vmem:[%s194_s7] sm:$0xff] %v330_v37 }
 0x15a   : > { %545 = shalt.err (!%p542_p3)
}
 0x15b   : > { %s546_s8 = scalar_lea.hbm %s763_s30, 128  ;;  %s550_s19 = scalar_lea.hbm %s807_s2, 256 }
 0x15c   : > { %p547_p4 = scmp.ne.s32.totalorder %s763_s30, %s546_s8  ;;  %p551_p7 = scmp.lt.u32.totalorder %s763_s30, %s807_s2 }
 0x15d   : > { %p552_p10 = scmp.lt.u32.totalorder %s550_s19, %s546_s8  ;;  %p554_p6 = scmp.lt.u32.totalorder %s546_s8, %s763_s30 }
 0x15e   : > { %p548_p5 = pnand %p547_p4, %p663_p9 }
 0x15f   : > { %p553_p11 = por %p552_p10, %p551_p7 }
 0x160   : > { %p549_p2 = pneg %p548_p5 }
 0x161   : > { %p555_p13 = por %p554_p6, %p553_p11 }
 0x163   : > { %p556_p8 = pnand %p555_p13, %p549_p2 }
 0x165   : > { %559 = shalt.err (!%p556_p8)
}
 0x166   : > { %451 = dma.vmem_to_hbm [thread:$0]  (%p663_p9), %s758_s22, 128, %s763_s30, %s333_s3  }
 0x167 PF: > { %s358_s5 = sand.u32 1, %s586_s9   ;;  %p812_p12 = scmp.ne.s32.totalorder %s811_s21, 0 }
 0x168   : > { %p813_p0 = scmp.ge.s32.totalorder %s598_s12, 2  ;;  %s359_s6 = scalar_lea.sflag [#allocation4], %s358_s5 }
 0x16a   : > { %p454_p1 = pnand %p813_p0, %p812_p12 }
 0x16c   : > { %581 = dma.done.wait (!%p454_p1), %s359_s6, 128  }
 0x16d   : > { %583 = vsyncadd (!%p454_p1), %s359_s6, 4294967168  ;;  %p15_p3 = scmp.ge.s32.totalorder %s644_s15, 4   ;;  %s814_s9 = smov %s590_s10 }
 0x16e   : > { %s815_s10 = smov %s594_s11  ;;  %s816_s11 = smov %s656_s18 }
 0x16f   : > { %s817_s12 = smov %s644_s15  ;;  %17 = sbr.rel (!%p15_p3) target bundleno = 5 (0x5), region = 76 }
 0x176   :  { %364 = vsyncpa [#allocation3], 1 }
 0x177   :  { %366 = vsyncpa [#allocation3 + $0x1], 1 }
 0x178   :  { %367 = vsyncpa [#allocation4], 1 }
 0x179   :  { %369 = vsyncpa [#allocation4 + $0x1], 1 }

</bundles_post_ra>
